<compile_context>
chip_gen: v7x
topology: tpu7x:2x2x1
jax: 0.10.0
libtpu: 0.0.40
codegen_flags: <defaults>
</compile_context>

<pallas_src>
import functools

import jax
import jax.numpy as jnp
from jax import lax
from jax.experimental import pallas as pl
from jax.experimental.pallas import tpu as pltpu

N_EMBD = 64
HIDDEN = 4 * N_EMBD  # 256

TM_DEFAULT = 4096    # token-tile rows per grid step (sweepable; v7x can go higher)
SUB_DEFAULT = 512    # rows per in-kernel sub-chunk (bounds the f32 intermediate)


def _round_up(a, b):
    return ((a + b - 1) // b) * b


def _ffwd_kernel(x_ref, w1_ref, b1_ref, w2_ref, b2_ref, o_ref, *, sub, n_sub):
    # x_ref : (TM, C)   f32  (cast to bf16 in-kernel, per sub-chunk)
    # w1_ref: (C, H)    bf16 (VMEM-resident, constant index_map)
    # b1_ref: (1, H)    f32
    # w2_ref: (H, C)    bf16 (VMEM-resident)
    # b2_ref: (1, C)    f32
    # o_ref : (TM, C)   f32
    w1 = w1_ref[...]
    b1 = b1_ref[...]
    w2 = w2_ref[...]
    b2 = b2_ref[...]

    def body(s, carry):
        r0 = pl.multiple_of(s * sub, sub)
        xs = x_ref[pl.ds(r0, sub), :].astype(jnp.bfloat16)        # VPU cast
        h = jnp.dot(xs, w1, preferred_element_type=jnp.float32)    # MXU, f32 acc
        h = jnp.maximum(h + b1, 0.0)                                # bias + ReLU (f32)
        out = jnp.dot(h.astype(jnp.bfloat16), w2,
                      preferred_element_type=jnp.float32) + b2      # MXU, f32 acc
        o_ref[pl.ds(r0, sub), :] = out
        return carry

    lax.fori_loop(0, n_sub, body, None, unroll=True)
    # Dropout(p=0.0) is the identity -> nothing to do.


def feed_forward(x, w1, b1, w2, b2, *, tm=TM_DEFAULT, sub=SUB_DEFAULT):
    """x: (B, T, C) f32; w1: (C, H); b1: (H,); w2: (H, C); b2: (C,). Returns (B, T, C) f32."""
    B, T, C = x.shape
    assert C == N_EMBD and w1.shape == (C, HIDDEN) and w2.shape == (HIDDEN, C)
    M = B * T

    # Tile selection:
    #  * at most half the tokens per tile (rounded up to 8) so the grid always
    #    has >= 2 steps -> both TensorCores get work on v7x;
    #  * a multiple of the sub-chunk so the in-kernel loop is exact.
    half = _round_up(pl.cdiv(M, 2), 8)
    tm_eff = min(tm, half)
    sub_eff = min(sub, tm_eff)
    if tm_eff > sub_eff:
        tm_eff = (tm_eff // sub_eff) * sub_eff
    n_sub = tm_eff // sub_eff
    n_tiles = pl.cdiv(M, tm_eff)          # ragged last block handled by Pallas

    x2d = x.reshape(M, C).astype(jnp.float32)      # stays f32; cast happens in-kernel
    w1_bf16 = w1.astype(jnp.bfloat16)
    w2_bf16 = w2.astype(jnp.bfloat16)
    b1_2d = b1.reshape(1, HIDDEN).astype(jnp.float32)
    b2_2d = b2.reshape(1, C).astype(jnp.float32)

    flops = 4 * M * C * HIDDEN                     # two matmuls, 2*M*C*H each
    bytes_accessed = (
        M * C * 4 + M * C * 4                      # x read (f32) + out write (f32)
        + (w1_bf16.size + w2_bf16.size) * 2        # resident weights (fetched once)
        + (b1_2d.size + b2_2d.size) * 4
    )

    kernel = functools.partial(_ffwd_kernel, sub=sub_eff, n_sub=n_sub)

    out = pl.pallas_call(
        kernel,
        out_shape=jax.ShapeDtypeStruct((M, C), jnp.float32),
        grid_spec=pl.GridSpec(
            grid=(n_tiles,),
            in_specs=[
                pl.BlockSpec((tm_eff, C), lambda i: (i, 0)),     # x token tile (f32)
                pl.BlockSpec((C, HIDDEN), lambda i: (0, 0)),     # W1 (resident)
                pl.BlockSpec((1, HIDDEN), lambda i: (0, 0)),     # b1 (resident)
                pl.BlockSpec((HIDDEN, C), lambda i: (0, 0)),     # W2 (resident)
                pl.BlockSpec((1, C), lambda i: (0, 0)),          # b2 (resident)
            ],
            out_specs=pl.BlockSpec((tm_eff, C), lambda i: (i, 0)),
        ),
        compiler_params=pltpu.CompilerParams(
            dimension_semantics=("parallel",),
            vmem_limit_bytes=32 * 1024 * 1024,
        ),
        cost_estimate=pl.CostEstimate(
            flops=flops, transcendentals=0, bytes_accessed=bytes_accessed),
    )(x2d, w1_bf16, b1_2d, w2_bf16, b2_2d)

    return out.reshape(B, T, C)


def init_params(key):
    k1, k2, k3, k4 = jax.random.split(key, 4)
    # Deterministic synthetic init (PyTorch-like uniform fan_in bounds).
    bound1 = 1.0 / (N_EMBD ** 0.5)
    bound2 = 1.0 / (HIDDEN ** 0.5)
    w1 = jax.random.uniform(k1, (N_EMBD, HIDDEN), jnp.float32, -bound1, bound1)
    b1 = jax.random.uniform(k2, (HIDDEN,), jnp.float32, -bound1, bound1)
    w2 = jax.random.uniform(k3, (HIDDEN, N_EMBD), jnp.float32, -bound2, bound2)
    b2 = jax.random.uniform(k4, (N_EMBD,), jnp.float32, -bound2, bound2)
    return w1, b1, w2, b2


def _reference(x, w1, b1, w2, b2):
    # Pure-JAX f32 reference (Dropout p=0.0 is identity).
    return jnp.maximum(x @ w1 + b1, 0.0) @ w2 + b2


if __name__ == "__main__":
    key = jax.random.PRNGKey(0)
    kx, kp, kx2 = jax.random.split(key, 3)
    w1, b1, w2, b2 = init_params(kp)

    # Small shape matching the module (batch=2, seq=8, n_embd=64).
    B, T = 2, 8
    x = jax.random.normal(kx, (B, T, N_EMBD), jnp.float32)
    out = jax.block_until_ready(feed_forward(x, w1, b1, w2, b2))
    ref = _reference(x, w1, b1, w2, b2)
    assert out.shape == (B, T, N_EMBD)
    # bf16 MXU inputs -> loosen tolerance vs. the f32 reference.
    assert jnp.allclose(out, ref, atol=2e-2, rtol=2e-2), \
        float(jnp.max(jnp.abs(out - ref)))

    # Exercise multi-tile + ragged last block + multi-sub-chunk paths:
    # M=1200 with tm=1024/sub=256 -> tm_eff=512, 3 tiles (last ragged), 2 sub-chunks.
    B2, T2 = 4, 300
    x2 = jax.random.normal(kx2, (B2, T2, N_EMBD), jnp.float32)
    out2 = jax.block_until_ready(
        feed_forward(x2, w1, b1, w2, b2, tm=1024, sub=256))
    ref2 = _reference(x2, w1, b1, w2, b2)
    assert out2.shape == (B2, T2, N_EMBD)
    assert jnp.allclose(out2, ref2, atol=2e-2, rtol=2e-2), \
        float(jnp.max(jnp.abs(out2 - ref2)))

    print("KERNEL_OK")
</pallas_src>

<mosaic_0001>
module attributes {stable_mosaic.version = 11 : i64} {
  func.func @_ffwd_kernel(%arg0: i32, %arg1: memref<8x64xf32, #tpu.memory_space<vmem>>, %arg2: memref<64x256xbf16, #tpu.memory_space<vmem>>, %arg3: memref<1x256xf32, #tpu.memory_space<vmem>>, %arg4: memref<256x64xbf16, #tpu.memory_space<vmem>>, %arg5: memref<1x64xf32, #tpu.memory_space<vmem>>, %arg6: memref<8x64xf32, #tpu.memory_space<vmem>>) attributes {dimension_semantics = [#tpu.dimension_semantics<parallel>], iteration_bounds = array<i64: 2>, scalar_prefetch = 0 : i64, scratch_operands = 0 : i64, tpu.core_type = #tpu.core_type<tc>, window_params = [{transform_indices = @transform_0, window_bounds = array<i64: 8, 64>}, {pipeline_mode = #tpu.pipeline_mode<synchronous>, transform_indices = @transform_1, window_bounds = array<i64: 64, 256>}, {pipeline_mode = #tpu.pipeline_mode<synchronous>, transform_indices = @transform_2, window_bounds = array<i64: 1, 256>}, {pipeline_mode = #tpu.pipeline_mode<synchronous>, transform_indices = @transform_3, window_bounds = array<i64: 256, 64>}, {pipeline_mode = #tpu.pipeline_mode<synchronous>, transform_indices = @transform_4, window_bounds = array<i64: 1, 64>}, {transform_indices = @transform_5, window_bounds = array<i64: 8, 64>}]} {
    %c0 = arith.constant 0 : index
    %c0_0 = arith.constant 0 : index
    %0 = vector.load %arg2[%c0, %c0_0] : memref<64x256xbf16, #tpu.memory_space<vmem>>, vector<64x256xbf16>
    %c0_1 = arith.constant 0 : index
    %c0_2 = arith.constant 0 : index
    %1 = vector.load %arg3[%c0_1, %c0_2] : memref<1x256xf32, #tpu.memory_space<vmem>>, vector<1x256xf32>
    %c0_3 = arith.constant 0 : index
    %c0_4 = arith.constant 0 : index
    %2 = vector.load %arg4[%c0_3, %c0_4] : memref<256x64xbf16, #tpu.memory_space<vmem>>, vector<256x64xbf16>
    %c0_5 = arith.constant 0 : index
    %c0_6 = arith.constant 0 : index
    %3 = vector.load %arg5[%c0_5, %c0_6] : memref<1x64xf32, #tpu.memory_space<vmem>>, vector<1x64xf32>
    %c0_i32 = arith.constant 0 : i32
    %c8_i32 = arith.constant 8 : i32
    %4 = arith.muli %c0_i32, %c8_i32 : i32
    %5 = tpu.assume_multiple %4, 8 : i32
    %6 = arith.index_cast %5 : i32 to index
    %c0_7 = arith.constant 0 : index
    %7 = vector.load %arg1[%6, %c0_7] : memref<8x64xf32, #tpu.memory_space<vmem>>, vector<8x64xf32>
    %8 = arith.truncf %7 : vector<8x64xf32> to vector<8x64xbf16>
    %cst = arith.constant dense<0.000000e+00> : vector<8x256xf32>
    %9 = tpu.matmul %8, %0, %cst {dimension_numbers = #tpu.dot_dimension_numbers<[1], [0], [0], [1], [0, 0, 1, 1], [], []>} : vector<8x64xbf16>, vector<64x256xbf16>, vector<8x256xf32> -> vector<8x256xf32>
    %10 = vector.broadcast %1 : vector<1x256xf32> to vector<8x256xf32>
    %11 = arith.addf %9, %10 : vector<8x256xf32>
    %cst_8 = arith.constant 0.000000e+00 : f32
    %12 = vector.broadcast %cst_8 : f32 to vector<8x256xf32>
    %13 = arith.maximumf %11, %12 : vector<8x256xf32>
    %14 = arith.truncf %13 : vector<8x256xf32> to vector<8x256xbf16>
    %cst_9 = arith.constant dense<0.000000e+00> : vector<8x64xf32>
    %15 = tpu.matmul %14, %2, %cst_9 {dimension_numbers = #tpu.dot_dimension_numbers<[1], [0], [0], [1], [0, 0, 1, 1], [], []>} : vector<8x256xbf16>, vector<256x64xbf16>, vector<8x64xf32> -> vector<8x64xf32>
    %16 = vector.broadcast %3 : vector<1x64xf32> to vector<8x64xf32>
    %17 = arith.addf %15, %16 : vector<8x64xf32>
    %18 = arith.index_cast %5 : i32 to index
    %c0_10 = arith.constant 0 : index
    %19 = vector.load %arg6[%18, %c0_10] : memref<8x64xf32, #tpu.memory_space<vmem>>, vector<8x64xf32>
    tpu.vector_store %arg6[%18, %c0_10], %17 {strides = array<i32>} : memref<8x64xf32, #tpu.memory_space<vmem>>, vector<8x64xf32>,
    %c1_i32 = arith.constant 1 : i32
    return
  }
  func.func @transform_0(%arg0: i32) -> (i32, i32) {
    %c0_i32 = arith.constant 0 : i32
    %c0_i32_0 = arith.constant 0 : i32
    return %arg0, %c0_i32 : i32, i32
  }
  func.func @transform_1(%arg0: i32) -> (i32, i32) {
    %c0_i32 = arith.constant 0 : i32
    %c0_i32_0 = arith.constant 0 : i32
    %c0_i32_1 = arith.constant 0 : i32
    return %c0_i32, %c0_i32_0 : i32, i32
  }
  func.func @transform_2(%arg0: i32) -> (i32, i32) {
    %c0_i32 = arith.constant 0 : i32
    %c0_i32_0 = arith.constant 0 : i32
    %c0_i32_1 = arith.constant 0 : i32
    return %c0_i32, %c0_i32_0 : i32, i32
  }
  func.func @transform_3(%arg0: i32) -> (i32, i32) {
    %c0_i32 = arith.constant 0 : i32
    %c0_i32_0 = arith.constant 0 : i32
    %c0_i32_1 = arith.constant 0 : i32
    return %c0_i32, %c0_i32_0 : i32, i32
  }
  func.func @transform_4(%arg0: i32) -> (i32, i32) {
    %c0_i32 = arith.constant 0 : i32
    %c0_i32_0 = arith.constant 0 : i32
    %c0_i32_1 = arith.constant 0 : i32
    return %c0_i32, %c0_i32_0 : i32, i32
  }
  func.func @transform_5(%arg0: i32) -> (i32, i32) {
    %c0_i32 = arith.constant 0 : i32
    %c0_i32_0 = arith.constant 0 : i32
    return %arg0, %c0_i32 : i32, i32
  }
}

</mosaic_0001>

<bundles_post_ra>
// kernel: tpu_custom_call.1
= control target key start
LH: loop header
LB: loop body
LE: loop exit
PB: predicated region body
PF: predicated region fallthrough
CT: control target
= control target key end

     0   :  { %10 = vsyncpa [#allocation3], 0  ;;  %s983_s0 = inlined_call_operand.vmem [shape: f32[16,64], index: 0, kind: input, shape index: {}]   ;;  %s984_s1 = inlined_call_operand.vmem [shape: bf16[64,256], index: 1, kind: input, shape index: {}]   ;;  %s985_s2 = inlined_call_operand.vmem [shape: f32[1,256], index: 2, kind: input, shape index: {}]   ;;  %s986_s3 = inlined_call_operand.vmem [shape: bf16[256,64], index: 3, kind: input, shape index: {}]   ;;  %s987_s4 = inlined_call_operand.vmem [shape: f32[1,64], index: 4, kind: input, shape index: {}]   ;;  %s988_s5 = inlined_call_operand.hbm [shape: f32[16,64], index: 5, kind: output, shape index: {}]  }
   0x1   :  { %12 = vsyncpa [#allocation3 + $0x1], 0  ;;  %s803_s18 = smov 0   ;;  %s805_s19 = smov 0  }
   0x2   :  { %s807_s20 = smov 0   ;;  %s809_s21 = smov 0  }
   0x3 LB: > { %s824_s22 = sadd.s32 4294967295, %s769_s21   ;;  %s581_s23 = sadd.s32 4294967294, %s769_s21   ;;  %s769_s21 = sphi %s809_s21, %s994_s21   ;;  %s765_s20 = sphi %s807_s20, %s993_s20   ;;  %s761_s19 = sphi %s805_s19, %s992_s19   ;;  %s757_s18 = sphi %s803_s18, %s991_s18  }
   0x4   : > { %s828_s24 = sadd.s32 1, %s769_s21   ;;  %s135_s25 = sadd.s32 1, %s765_s20 }
   0x5   : > { %s132_s26 = ssub.s32 %s769_s21, %s828_s24  ;;  %p145_p0 = scmp.ne.s32.totalorder %s765_s20, %s761_s19 }
   0x6   : > { %p133_p1 = scmp.eq.s32.totalorder %s132_s26, 0  ;;  %p146_p2 = scmp.eq.s32.totalorder %s824_s22, 1 }
   0x7   : > { %p151_p3 = scmp.ne.s32.totalorder %s761_s19, %s757_s18  ;;  %p152_p4 = scmp.eq.s32.totalorder %s581_s23, 1 }
   0x8   : > { %s839_s27 = scalar_select %p133_p1, %s765_s20, %s135_s25  }
   0x9   : > { %p841_p5 = por %p146_p2, %p145_p0  ;;  %p845_p6 = por %p152_p4, %p151_p3 }
   0xa   : > { %p584_p7 = scmp.ge.s32.totalorder %s769_s21, 1  ;;  %p189_p8 = scmp.lt.s32.totalorder %s769_s21, 3 }
   0xc   : > { %p190_p9 = pnand %p584_p7, %p189_p8 }
   0xd   : > { %v679_v0 = vld [vmem:[%s984_s1 + $0x4] ss:$8 sps:$4 sm:$0xff] (!%p190_p9)   ;;  %p216_p10 = scmp.lt.s32.totalorder (!%p190_p9), %s824_s22, 1  ;;  %v681_v1 = vld [vmem:[%s984_s1] ss:$8 sps:$4 sm:$0xff] (!%p190_p9)   ;;  %v771_v2 = vmov (!%p190_p9), 0   ;;  %v266_v27 = vlaneseq (!%p190_p9) }
   0xe   : > { %193 = sbr.rel (%p190_p9) target bundleno = 481 (0x1e1), region = 40  ;;  %352 = vmatprep.mubr.bf16.mxu0 (!%p190_p9), %v771_v2  ;;  %320 = vmatprep.subr.bf16.mxu0 (!%p190_p9), %v679_v0  ;;  %v682_v3 = vld [vmem:[%s984_s1 + $0x14] ss:$8 sps:$4 sm:$0xff] (!%p190_p9)   ;;  %v684_v4 = vld [vmem:[%s984_s1 + $0x10] ss:$8 sps:$4 sm:$0xff] (!%p190_p9)   ;;  %v691_v8 = vld [vmem:[%s986_s3 + $0x40] sm:$0xff] (!%p190_p9)  }
   0xf   : > { %321 = vmatpush1.bf16.msra.mxu0 (!%p190_p9), %v681_v1  ;;  %v685_v5 = vld [vmem:[%s984_s1 + $0x24] ss:$8 sps:$4 sm:$0xff] (!%p190_p9)   ;;  %v687_v6 = vld [vmem:[%s984_s1 + $0x20] ss:$8 sps:$4 sm:$0xff] (!%p190_p9)   ;;  %v688_v7 = vld [vmem:[%s984_s1 + $0x34] ss:$8 sps:$4 sm:$0xff] (!%p190_p9)   ;;  %617 = vmatprep.subr.bf16.mxu1 (!%p190_p9), %v691_v8 }
  0x10   : > { %322 = vmatprep.subr.bf16.mxu0 (!%p190_p9), %v682_v3  ;;  %v692_v9 = vld [vmem:[%s986_s3] sm:$0xff] (!%p190_p9)   ;;  %v693_v10 = vld [vmem:[%s986_s3 + $0x48] sm:$0xff] (!%p190_p9)   ;;  %v690_v11 = vld [vmem:[%s984_s1 + $0x30] ss:$8 sps:$4 sm:$0xff] (!%p190_p9)   ;;  %vm316_vm0 = vcmask (!%p190_p9), 523264   ;;  %v267_v28 = vshrl.u32 (!%p190_p9), %v266_v27, 7 }
  0x11   : > { %618 = vmatpush3.bf16.msra.mxu1 (!%p190_p9), %v692_v9  ;;  %v694_v12 = vld [vmem:[%s986_s3 + $0x8] sm:$0xff] (!%p190_p9)   ;;  %v695_v13 = vld [vmem:[%s986_s3 + $0x50] sm:$0xff] (!%p190_p9)   ;;  %v697_v17 = vld [vmem:[%s986_s3 + $0x58] sm:$0xff] (!%p190_p9)   ;;  %s614_s16 = sshll.u32 (!%p190_p9), %s824_s22, 7  ;;  %s772_s7 = smov (!%p190_p9), [#allocation2]  }
  0x12   : > { %619 = vmatprep.subr.bf16.mxu1 (!%p190_p9), %v693_v10  ;;  %v696_v15 = vld [vmem:[%s986_s3 + $0x10] sm:$0xff] (!%p190_p9)   ;;  %v698_v18 = vld [vmem:[%s986_s3 + $0x18] sm:$0xff] (!%p190_p9)   ;;  %v699_v19 = vld [vmem:[%s986_s3 + $0x60] sm:$0xff] (!%p190_p9)   ;;  %v268_v29 = vsub.s32 (!%p190_p9), 0, %v267_v28  ;;  %v272_v31 = vsub.s32 (!%p190_p9), 1, %v267_v28  ;;  %s940_s30 = scalar_lea.hbm (!%p190_p9), %s988_s5, %s614_s16  ;;  %s711_s8 = sshll.u32 (!%p190_p9), %s772_s7, 4  ;;  %s712_s8 = int_to_ptr.vmem [resolvable:$false] %s711_s8 }
  0x13   : > { %323 = vmatpush1.bf16.msra.mxu0 (!%p190_p9), %v684_v4  ;;  %v700_v20 = vld [vmem:[%s986_s3 + $0x20] sm:$0xff] (!%p190_p9)   ;;  %v701_v21 = vld [vmem:[%s986_s3 + $0x68] sm:$0xff] (!%p190_p9)   ;;  %v703_v23 = vld [vmem:[%s986_s3 + $0x70] sm:$0xff] (!%p190_p9)   ;;  %s713_s9 = scalar_lea.vmem (!%p190_p9), %s712_s8, 256 }
  0x14   : > { %324 = vmatprep.subr.bf16.mxu0 (!%p190_p9), %v685_v5  ;;  %v702_v22 = vld [vmem:[%s986_s3 + $0x28] sm:$0xff] (!%p190_p9)   ;;  %v704_v24 = vld [vmem:[%s986_s3 + $0x30] sm:$0xff] (!%p190_p9)   ;;  %v705_v25 = vld [vmem:[%s986_s3 + $0x78] sm:$0xff] (!%p190_p9)  }
  0x15   : > { %s217_s11 = scalar_select %p216_p10, %s824_s22, 1  ;;  %620 = vmatpush3.bf16.msra.mxu1 %v694_v12  ;;  %v706_v26 = vld [vmem:[%s986_s3 + $0x38] sm:$0xff]   ;;  %v229_v30 = vld [vmem:[%s985_s2] sm:$0x3] }
  0x16   : > { %621 = vmatprep.subr.bf16.mxu1 %v695_v13  ;;  %v269_v32 = vrot.slane %v229_v30, %v268_v29  ;;  %v273_v33 = vrot.slane %v229_v30, %v272_v31  ;;  %v596_v45 = vld [vmem:[%s987_s4] ss:$0 sm:$0xff] }
  0x17   : > { %s586_s23 = sshll.u32 %s217_s11, 3  ;;  %325 = vmatpush1.bf16.msra.mxu0 %v687_v6  ;;  %s213_s11 = sand.u32 1, %s761_s19  }
  0x18   : > { %s219_s12 = scalar_lea.vmem %s983_s0, %s586_s23  ;;  %326 = vmatprep.subr.bf16.mxu0 %v688_v7  ;;  %s585_s13 = sshll.u32 %s213_s11, 3 }
  0x19   : > { %v263_v14 = vld [vmem:[%s219_s12] sm:$0xff]  ;;  %622 = vmatpush3.bf16.msra.mxu1 %v696_v15  ;;  %s215_s17 = scalar_lea.vmem [#allocation2], %s585_s13  ;;  %s509_s6 = scalar_lea.sflag [#allocation3], %s213_s11 }
  0x1a   : > { %v264_v16 = vpack.c.bf16 %v263_v14, %v263_v14  ;;  %623 = vmatprep.subr.bf16.mxu1 %v697_v17  ;;  %s522_s25 = sshll.u32 %s215_s17, 4  ;;  %s942_s25 = int_to_ptr.vmem [resolvable:$true] %s522_s25 }
  0x1b   : > { %327 = vmatpush1.bf16.msra.mxu0 %v690_v11  ;;  %s707_s22 = scalar_lea.vmem %s942_s25, 128  ;;  %p714_p0 = scmp.lt.s32.totalorder %s942_s25, %s712_s8 }
  0x1c   : > { %p708_p11 = scmp.ne.s32.totalorder %s942_s25, %s707_s22  ;;  %p715_p1 = scmp.lt.s32.totalorder %s713_s9, %s707_s22 }
  0x1d   : > { %624 = vmatpush3.bf16.msra.mxu1 %v698_v18 }
  0x1e   : > { %595 = vmatmul.mubr.msk.bf16.vlgmr.msra.gmra.mrb[0].mxu0 %vm316_vm0, %v264_v16  ;;  %625 = vmatprep.subr.bf16.mxu1 %v699_v19  ;;  %p709_p12 = pnand %p708_p11, %p841_p5  ;;  %p716_p2 = por %p715_p1, %p714_p0 }
  0x20   : > { %p710_p13 = pneg %p709_p12 }
  0x21   : > { %626 = vmatpush3.bf16.msra.mxu1 %v700_v20 }
  0x22   : > { %627 = vmatprep.subr.bf16.mxu1 %v701_v21  ;;  %p717_p3 = pnand %p716_p2, %p710_p13 }
  0x25   : > { %628 = vmatpush3.bf16.msra.mxu1 %v702_v22 }
  0x26   : > { %629 = vmatprep.subr.bf16.mxu1 %v703_v23 }
  0x29   : > { %630 = vmatpush3.bf16.msra.mxu1 %v704_v24 }
  0x2a   : > { %631 = vmatprep.subr.bf16.mxu1 %v705_v25 }
  0x2d   : > { %632 = vmatpush3.bf16.msra.mxu1 %v706_v26 }
  0xf1   : > { %v354_v34 = vpop.f32.mrb[0].mxu0 }
  0xf2   : > { %v355_v35 = vadd.f32 %v354_v34, %v269_v32  ;;  %v356_v36 = vpop.f32.mrb[1].mxu0 }
  0xf3   : > { %v357_v37 = vadd.f32 %v356_v36, %v273_v33  ;;  %v358_v38 = vpop.f32.mrb[2].mxu0 }
  0xf4   : > { %v361_v39 = vmax.f32 %v355_v35, 0.0  ;;  %v359_v40 = vpop.f32.mrb[3].mxu0 }
  0xf5   : > { %v362_v41 = vmax.f32 %v357_v37, 0.0 }
  0xf6   : > { %v363_v43 = vpack.c.bf16 %v361_v39, %v361_v39 }
  0xf7   : > { %v364_v42 = vpack.c.bf16 %v362_v41, %v362_v41 }
  0xf9   : > { %499 = vmatprep.mubr.bf16.mxu1 %v364_v42 }
  0xfa   : > { %500 = vmatmul.mubr.bf16.vlgmr.msra.gmra.mrb[0].mxu1 %v363_v43 }
 0x1cd   : > { %v633_v44 = vpop.f32.mrb[0].mxu1 }
 0x1ce   : > { %v634_v46 = vpop.f32.mrb[1].mxu1 }
 0x1cf   : > { %v635_v47 = vadd.f32 %v634_v46, %v633_v44  ;;  %v636_v48 = vpop.f32.mrb[2].mxu1 }
 0x1d0   : > { %v637_v49 = vpop.f32.mrb[3].mxu1 }
 0x1d1   : > { %v502_v50 = vadd.f32 %v635_v47, %v596_v45 }
 0x1d3   : > { %507 = vst.msk [vmem:[%s215_s17] sm:$0xff] %vm316_vm0, %v502_v50 }
 0x1d4   : > { %720 = shalt.err (!%p717_p3)
}
 0x1d5   : > { %s721_s10 = scalar_lea.hbm %s940_s30, 128  ;;  %s725_s13 = scalar_lea.hbm %s988_s5, 256 }
 0x1d6   : > { %p722_p4 = scmp.ne.s32.totalorder %s940_s30, %s721_s10  ;;  %p726_p9 = scmp.lt.u32.totalorder %s940_s30, %s988_s5 }
 0x1d7   : > { %p727_p10 = scmp.lt.u32.totalorder %s725_s13, %s721_s10  ;;  %p729_p12 = scmp.lt.u32.totalorder %s721_s10, %s940_s30 }
 0x1d8   : > { %p723_p7 = pnand %p722_p4, %p841_p5 }
 0x1d9   : > { %p728_p11 = por %p727_p10, %p726_p9 }
 0x1da   : > { %p724_p8 = pneg %p723_p7 }
 0x1db   : > { %p730_p13 = por %p729_p12, %p728_p11 }
 0x1dd   : > { %p731_p0 = pnand %p730_p13, %p724_p8 }
 0x1df   : > { %734 = shalt.err (!%p731_p0)
}
 0x1e0   : > { %639 = dma.vmem_to_hbm [thread:$0]  (%p841_p5), %s942_s25, 128, %s940_s30, %s509_s6  }
 0x1e1 PF: > { %p645_p1 = scmp.ge.s32.totalorder %s769_s21, 2  ;;  %s534_s16 = sand.u32 1, %s757_s18  }
 0x1e2   : > { %s535_s17 = scalar_lea.sflag [#allocation3], %s534_s16 }
 0x1e3   : > { %p642_p2 = pnand %p645_p1, %p845_p6 }
 0x1e5   : > { %752 = dma.done.wait (!%p642_p2), %s535_s17, 128  }
 0x1e6   : > { %754 = vsyncadd (!%p642_p2), %s535_s17, 4294967168  ;;  %p15_p3 = scmp.ge.s32.totalorder %s828_s24, 4   ;;  %s991_s18 = smov %s761_s19 }
 0x1e7   : > { %s992_s19 = smov %s765_s20  ;;  %s993_s20 = smov %s839_s27 }
 0x1e8   : > { %s994_s21 = smov %s828_s24  ;;  %17 = sbr.rel (!%p15_p3) target bundleno = 3 (0x3), region = 75 }
 0x1ef   :  { %540 = vsyncpa [#allocation3], 1 }
 0x1f0   :  { %542 = vsyncpa [#allocation3 + $0x1], 1 }

</bundles_post_ra>
